<compile_context>
chip_gen: v7x
topology: tpu7x:2x2x1
jax: 0.10.0
libtpu: 0.0.40
codegen_flags: <defaults>
</compile_context>

<pallas_src>
import functools
import numpy as np
import jax
import jax.numpy as jnp
from jax.experimental import pallas as pl
from jax.experimental.pallas import tpu as pltpu


# ------------------------------------------------------------------ #
# helpers
# ------------------------------------------------------------------ #

def _round_up(x, m):
    return ((x + m - 1) // m) * m


def _pad_k(fan_in):
    """Padded reduction size: multiple of 128; prefer a 256/512-divisible pad
    when the extra zero-K work is small (fewer, larger K tiles)."""
    base = _round_up(fan_in, 128)
    for c in (512, 256):
        if base % c == 0:
            return base
    for c in (512, 256):
        kp = _round_up(fan_in, c)
        if kp - base <= 128 and (kp - base) * 8 <= base:
            return kp
    return base


def _pick_tile_k(kp):
    for c in (512, 256, 128):
        if kp % c == 0:
            return c
    return 128


def _pick_tile_n(npad):
    for c in (1024, 512, 256, 128):
        if npad % c == 0:
            return c
    return 128


def _pick_row_tile(mp, npad):
    """Row tile for elementwise kernels: multiple of 16 (bf16 packing),
    divides mp, block stays under ~1 MiB so big-channel layers fit v7x VMEM."""
    cap = max(16, (512 * 1024) // max(npad, 128))
    for c in (512, 256, 128, 64, 32, 16):
        if c <= cap and mp % c == 0:
            return c
    return 16


# ------------------------------------------------------------------ #
# Pallas kernels
# ------------------------------------------------------------------ #

def _conv_mm_kernel(a_ref, w_ref, b_ref, o_ref, s_ref, q_ref, acc_ref,
                    *, m_true, tm):
    """bf16 @ bf16 MXU matmul accumulated in an f32 VMEM scratch.
    Epilogue (last K step): row-masked bias add (padded rows stay exactly 0 so
    the fused BN statistics are exact), bf16 output cast and per-channel
    sum / sum-of-squares.  program_id/num_programs only at top level."""
    i = pl.program_id(0)
    k = pl.program_id(2)
    nk = pl.num_programs(2)
    rows = i * tm + jax.lax.broadcasted_iota(jnp.int32, (tm, 1), 0)
    row_ok = rows < m_true

    @pl.when(k == 0)
    def _():
        acc_ref[...] = jnp.zeros(acc_ref.shape, acc_ref.dtype)

    acc_ref[...] += jnp.dot(a_ref[...], w_ref[...],
                            preferred_element_type=jnp.float32)

    @pl.when(k == nk - 1)
    def _():
        o = acc_ref[...] + jnp.where(row_ok, b_ref[...], 0.0)
        o_ref[...] = o.astype(o_ref.dtype)
        cs = jnp.sum(o, axis=0, keepdims=True)
        cq = jnp.sum(o * o, axis=0, keepdims=True)
        s_ref[...] = jnp.broadcast_to(cs, s_ref.shape)
        q_ref[...] = jnp.broadcast_to(cq, q_ref.shape)


def _affine_kernel(x_ref, s_ref, b_ref, o_ref, *, relu):
    y = x_ref[...].astype(jnp.float32) * s_ref[...] + b_ref[...]
    if relu:
        y = jnp.maximum(y, 0.0)
    o_ref[...] = y.astype(o_ref.dtype)


def _affine_stats_kernel(x_ref, s_ref, b_ref, o_ref, sum_ref, sq_ref,
                         *, relu, m_true, tr):
    i = pl.program_id(0)
    rows = i * tr + jax.lax.broadcasted_iota(jnp.int32, (tr, 1), 0)
    y = x_ref[...].astype(jnp.float32) * s_ref[...] + b_ref[...]
    if relu:
        y = jnp.maximum(y, 0.0)
    o_ref[...] = y.astype(o_ref.dtype)
    ym = jnp.where(rows < m_true, y, 0.0)          # exclude padded rows
    cs = jnp.sum(ym, axis=0, keepdims=True)
    cq = jnp.sum(ym * ym, axis=0, keepdims=True)
    sum_ref[...] = jnp.broadcast_to(cs, sum_ref.shape)
    sq_ref[...] = jnp.broadcast_to(cq, sq_ref.shape)


def _bn_add_relu_kernel(x_ref, r_ref, sx_ref, bx_ref, sr_ref, br_ref, o_ref):
    """relu( BN3(conv3_out) + BN_down(downsample_out or identity) )."""
    y = x_ref[...].astype(jnp.float32) * sx_ref[...] + bx_ref[...]
    z = r_ref[...].astype(jnp.float32) * sr_ref[...] + br_ref[...]
    o_ref[...] = jnp.maximum(y + z, 0.0).astype(o_ref.dtype)


def _sigmoid_kernel(x_ref, o_ref):
    o_ref[...] = jax.nn.sigmoid(x_ref[...].astype(jnp.float32)).astype(o_ref.dtype)


def _maxpool_kernel(ee_ref, eo_ref, oe_ref, oo_ref, o_ref):
    """3x3 stride-2 max pool from four even/odd phase tensors (unit-stride
    static slices only)."""
    ee = ee_ref[0]
    eo = eo_ref[0]
    oe = oe_ref[0]
    oo = oo_ref[0]
    oh, ow = o_ref.shape[1], o_ref.shape[2]
    taps = (ee[:oh, :ow], eo[:oh, :ow], ee[:oh, 1:ow + 1],
            oe[:oh, :ow], oo[:oh, :ow], oe[:oh, 1:ow + 1],
            ee[1:oh + 1, :ow], eo[1:oh + 1, :ow], ee[1:oh + 1, 1:ow + 1])
    r = taps[0]
    for t in taps[1:]:
        r = jnp.maximum(r, t)
    o_ref[0] = r


# ------------------------------------------------------------------ #
# matmul wrapper
# ------------------------------------------------------------------ #

def conv_matmul(a, w, b, m_true):
    """A (M, Kp) bf16 @ W (Kp, Np) bf16 -> (Mp, Np) bf16 + fused col stats."""
    M, K = a.shape
    Kp, Np = w.shape
    assert K == Kp, (K, Kp)

    if M <= 512:
        Mp = _round_up(max(M, 16), 16)
        tm = Mp
    else:
        tm = 512 if M >= 4096 else 256
        Mp = _round_up(M, tm)
    tk = _pick_tile_k(Kp)
    tn = _pick_tile_n(Np)
    # expose >=2 blocks on a parallel axis (v7x has 2 TensorCores)
    if Mp // tm == 1 and Np // tn == 1 and tn >= 256:
        tn //= 2
    mb, nb, kb = Mp // tm, Np // tn, Kp // tk

    if Mp != M:
        a = jnp.pad(a, ((0, Mp - M), (0, 0)))

    kern = functools.partial(_conv_mm_kernel, m_true=m_true, tm=tm)
    out, ssum, ssq = pl.pallas_call(
        kern,
        out_shape=[jax.ShapeDtypeStruct((Mp, Np), jnp.bfloat16),
                   jax.ShapeDtypeStruct((mb * 8, Np), jnp.float32),
                   jax.ShapeDtypeStruct((mb * 8, Np), jnp.float32)],
        grid=(mb, nb, kb),
        in_specs=[pl.BlockSpec((tm, tk), lambda i, j, k: (i, k)),
                  pl.BlockSpec((tk, tn), lambda i, j, k: (k, j)),
                  pl.BlockSpec((1, tn), lambda i, j, k: (0, j))],
        out_specs=[pl.BlockSpec((tm, tn), lambda i, j, k: (i, j)),
                   pl.BlockSpec((8, tn), lambda i, j, k: (i, j)),
                   pl.BlockSpec((8, tn), lambda i, j, k: (i, j))],
        scratch_shapes=[pltpu.VMEM((tm, tn), jnp.float32)],
        compiler_params=pltpu.CompilerParams(
            dimension_semantics=("parallel", "parallel", "arbitrary"),
            vmem_limit_bytes=32 * 1024 * 1024),
    )(a, w, b)
    csum = jnp.sum(ssum[0::8], axis=0)
    csq = jnp.sum(ssq[0::8], axis=0)
    return out, csum, csq


# ------------------------------------------------------------------ #
# tiled elementwise wrappers (all operate on padded (Mp, Np) 2-D slabs)
# ------------------------------------------------------------------ #

def affine2d(x2d, scale, shift, relu):
    mp, npad = x2d.shape
    tr = _pick_row_tile(mp, npad)
    return pl.pallas_call(
        functools.partial(_affine_kernel, relu=relu),
        out_shape=jax.ShapeDtypeStruct((mp, npad), jnp.bfloat16),
        grid=(mp // tr,),
        in_specs=[pl.BlockSpec((tr, npad), lambda i: (i, 0)),
                  pl.BlockSpec((1, npad), lambda i: (0, 0)),
                  pl.BlockSpec((1, npad), lambda i: (0, 0))],
        out_specs=pl.BlockSpec((tr, npad), lambda i: (i, 0)),
        compiler_params=pltpu.CompilerParams(dimension_semantics=("parallel",)),
    )(x2d, scale, shift)


def affine_stats2d(x2d, scale, shift, relu, m_true):
    mp, npad = x2d.shape
    tr = _pick_row_tile(mp, npad)
    gb = mp // tr
    y, ssum, ssq = pl.pallas_call(
        functools.partial(_affine_stats_kernel, relu=relu, m_true=m_true, tr=tr),
        out_shape=[jax.ShapeDtypeStruct((mp, npad), jnp.bfloat16),
                   jax.ShapeDtypeStruct((gb * 8, npad), jnp.float32),
                   jax.ShapeDtypeStruct((gb * 8, npad), jnp.float32)],
        grid=(gb,),
        in_specs=[pl.BlockSpec((tr, npad), lambda i: (i, 0)),
                  pl.BlockSpec((1, npad), lambda i: (0, 0)),
                  pl.BlockSpec((1, npad), lambda i: (0, 0))],
        out_specs=[pl.BlockSpec((tr, npad), lambda i: (i, 0)),
                   pl.BlockSpec((8, npad), lambda i: (i, 0)),
                   pl.BlockSpec((8, npad), lambda i: (i, 0))],
        compiler_params=pltpu.CompilerParams(dimension_semantics=("parallel",)),
    )(x2d, scale, shift)
    return y, jnp.sum(ssum[0::8], axis=0), jnp.sum(ssq[0::8], axis=0)


def bn_add_relu2d(x2d, r2d, sx, bx, sr, br):
    mp, npad = x2d.shape
    tr = _pick_row_tile(mp, npad)
    return pl.pallas_call(
        _bn_add_relu_kernel,
        out_shape=jax.ShapeDtypeStruct((mp, npad), jnp.bfloat16),
        grid=(mp // tr,),
        in_specs=[pl.BlockSpec((tr, npad), lambda i: (i, 0)),
                  pl.BlockSpec((tr, npad), lambda i: (i, 0)),
                  pl.BlockSpec((1, npad), lambda i: (0, 0)),
                  pl.BlockSpec((1, npad), lambda i: (0, 0)),
                  pl.BlockSpec((1, npad), lambda i: (0, 0)),
                  pl.BlockSpec((1, npad), lambda i: (0, 0))],
        out_specs=pl.BlockSpec((tr, npad), lambda i: (i, 0)),
        compiler_params=pltpu.CompilerParams(dimension_semantics=("parallel",)),
    )(x2d, r2d, sx, bx, sr, br)


def sigmoid2d(x2d):
    mp, npad = x2d.shape
    tr = _pick_row_tile(mp, npad)
    return pl.pallas_call(
        _sigmoid_kernel,
        out_shape=jax.ShapeDtypeStruct((mp, npad), jnp.float32),
        grid=(mp // tr,),
        in_specs=[pl.BlockSpec((tr, npad), lambda i: (i, 0))],
        out_specs=pl.BlockSpec((tr, npad), lambda i: (i, 0)),
        compiler_params=pltpu.CompilerParams(dimension_semantics=("parallel",)),
    )(x2d)


# ------------------------------------------------------------------ #
# NN building blocks (glue around the Pallas kernels)
# ------------------------------------------------------------------ #

def extract_patches(x, kh, kw, stride, pad, kp):
    """im2col in bf16: NHWC -> (N, OH, OW, kp) with tap-major ordering and the
    K zero padding folded into the same concatenate (no extra pad pass)."""
    if pad > 0:
        x = jnp.pad(x, ((0, 0), (pad, pad), (pad, pad), (0, 0)))
    N, H, W, C = x.shape
    oh = (H - kh) // stride + 1
    ow = (W - kw) // stride + 1
    k = kh * kw * C
    if kh == 1 and kw == 1 and stride == 1 and pad == 0:
        out = x
        if kp > k:
            out = jnp.concatenate(
                [out, jnp.zeros((N, H, W, kp - k), x.dtype)], axis=-1)
        return out, oh, ow
    views = []
    for i in range(kh):
        for j in range(kw):
            views.append(x[:, i:i + stride * (oh - 1) + 1:stride,
                            j:j + stride * (ow - 1) + 1:stride, :])
    if kp > k:
        views.append(jnp.zeros((N, oh, ow, kp - k), x.dtype))
    return jnp.concatenate(views, axis=-1), oh, ow


def conv2d(x_nhwc, wp, kh, kw, stride, pad):
    """Conv via bf16 im2col + Pallas MXU matmul with fused bias + BN stats.
    Returns padded (Mp, Np) bf16 output, meta and real-channel col stats."""
    n = x_nhwc.shape[0]
    xb = x_nhwc.astype(jnp.bfloat16)
    patches, oh, ow = extract_patches(xb, kh, kw, stride, pad, wp['kp'])
    m = n * oh * ow
    a = patches.reshape(m, wp['kp'])
    out, csum, csq = conv_matmul(a, wp['w'], wp['b'], m)
    cout = wp['cout']
    meta = (n, oh, ow, cout, m)
    return out, meta, (csum[:cout], csq[:cout])


def bn_scale_shift(csum, csq, count, eps=1e-5):
    """Training-mode batch stats, biased variance, gamma=1 / beta=0 (fresh
    nn.BatchNorm2d).  f32 E[x^2]-E[x]^2 with a clamp against cancellation."""
    mean = csum / count
    var = jnp.maximum(csq / count - mean * mean, 0.0)
    scale = jax.lax.rsqrt(var + eps)
    shift = -mean * scale
    return scale, shift


def pad_params(scale, shift, npad):
    c = scale.shape[0]
    if npad > c:
        scale = jnp.pad(scale, (0, npad - c))
        shift = jnp.pad(shift, (0, npad - c))
    return scale.reshape(1, -1), shift.reshape(1, -1)


def to_nhwc(y2d, meta):
    n, oh, ow, cout, m = meta
    return y2d[:m, :cout].reshape(n, oh, ow, cout)


def conv_bn(x_nhwc, wp, kh, kw, stride, pad, relu):
    y2d, meta, (cs, cq) = conv2d(x_nhwc, wp, kh, kw, stride, pad)
    m = meta[4]
    s, b = pad_params(*bn_scale_shift(cs, cq, m), y2d.shape[1])
    return affine2d(y2d, s, b, relu), meta


def maxpool_3x3_s2_p1(x):
    """MaxPool2d(3, stride=2, padding=1): four even/odd phase tensors (one
    cheap deinterleave copy) + a Pallas 9-tap max kernel — no 9x HBM stack."""
    n, h, w, c = x.shape
    assert h % 2 == 0 and w % 2 == 0
    xp = jnp.pad(x, ((0, 0), (1, 1), (1, 1), (0, 0)),
                 constant_values=-jnp.inf)
    oh, ow = h // 2, w // 2
    ph = xp.reshape(n, oh + 1, 2, ow + 1, 2, c)
    ee = ph[:, :, 0, :, 0, :]
    eo = ph[:, :, 0, :, 1, :]
    oe = ph[:, :, 1, :, 0, :]
    oo = ph[:, :, 1, :, 1, :]
    in_specs = [pl.BlockSpec((1, oh + 1, ow + 1, c), lambda i: (i, 0, 0, 0))
                for _ in range(4)]
    return pl.pallas_call(
        _maxpool_kernel,
        out_shape=jax.ShapeDtypeStruct((n, oh, ow, c), x.dtype),
        grid=(n,),
        in_specs=in_specs,
        out_specs=pl.BlockSpec((1, oh, ow, c), lambda i: (i, 0, 0, 0)),
        compiler_params=pltpu.CompilerParams(dimension_semantics=("parallel",)),
    )(ee, eo, oe, oo)


def pixel_shuffle(x, r):
    n, h, w, c = x.shape
    co = c // (r * r)
    x = x.reshape(n, h, w, co, r, r)
    x = jnp.transpose(x, (0, 1, 4, 2, 5, 3))
    return x.reshape(n, h * r, w * r, co)


def decoder_block(x_nhwc, wp):
    """conv -> BN1+ReLU -> BN2+ReLU -> PixelShuffle.  PixelShuffle commutes
    with a per-channel affine+ReLU when the BN2 params are repeated over each
    group of r*r pre-shuffle channels, so BN2 is applied before the shuffle
    using channel-grouped statistics emitted by the BN1 kernel (identical to
    conv->BN1->ReLU->shuffle->BN2->ReLU)."""
    y2d, meta, (cs, cq) = conv2d(x_nhwc, wp, 3, 3, 1, 1)
    n, oh, ow, cmid, m = meta
    npad = y2d.shape[1]
    s1, b1 = pad_params(*bn_scale_shift(cs, cq, m), npad)
    y2d, osum, osq = affine_stats2d(y2d, s1, b1, relu=True, m_true=m)
    r2 = 4  # upscale_factor ** 2
    gsum = osum[:cmid].reshape(cmid // r2, r2).sum(axis=1)
    gsq = osq[:cmid].reshape(cmid // r2, r2).sum(axis=1)
    s2, b2 = bn_scale_shift(gsum, gsq, m * r2)
    s2r, b2r = pad_params(jnp.repeat(s2, r2), jnp.repeat(b2, r2), npad)
    y2d = affine2d(y2d, s2r, b2r, relu=True)
    return pixel_shuffle(to_nhwc(y2d, meta), 2)


def bottleneck(x, blk, stride, has_down):
    y1, m1 = conv_bn(x, blk['w1'], 1, 1, 1, 0, relu=True)
    out1 = to_nhwc(y1, m1)
    y2, m2 = conv_bn(out1, blk['w2'], 3, 3, stride, 1, relu=True)   # v1.5 stride
    out2 = to_nhwc(y2, m2)
    y3, meta3, (cs3, cq3) = conv2d(out2, blk['w3'], 1, 1, 1, 0)
    n, oh, ow, cout, m = meta3
    npad = y3.shape[1]
    s3, b3 = pad_params(*bn_scale_shift(cs3, cq3, m), npad)
    if has_down:
        yd, _, (csd, cqd) = conv2d(x, blk['wd'], 1, 1, stride, 0)
        sd, bd = pad_params(*bn_scale_shift(csd, cqd, m), npad)
        r2d = yd
    else:
        r2d = x.astype(jnp.bfloat16).reshape(m, -1)
        mp = y3.shape[0]
        if r2d.shape[0] != mp:
            r2d = jnp.pad(r2d, ((0, mp - r2d.shape[0]), (0, 0)))
        if r2d.shape[1] != npad:
            r2d = jnp.pad(r2d, ((0, 0), (0, npad - r2d.shape[1])))
        sd = jnp.ones((1, npad), jnp.float32)
        bd = jnp.zeros((1, npad), jnp.float32)
    y = bn_add_relu2d(y3, r2d, s3, b3, sd, bd)     # BN3 + BN_down + add + ReLU
    return to_nhwc(y, meta3)


def run_layer(x, blocks, stride):
    for b_idx, blk in enumerate(blocks):
        x = bottleneck(x, blk, stride if b_idx == 0 else 1,
                       has_down=(b_idx == 0))
    return x


# ------------------------------------------------------------------ #
# Parameters (deterministic synthetic init, pre-padded / pre-cast to bf16)
# ------------------------------------------------------------------ #

def _pack_conv(key, kh, kw, cin, cout, bias=False):
    # NOTE: weights use (kh, kw, cin)-major flattening to match the im2col tap
    # ordering; real PyTorch OIHW weights would need a permutation when packed.
    k1, k2 = jax.random.split(key)
    fan_in = kh * kw * cin
    kp = _pad_k(fan_in)
    npad = _round_up(cout, 128)
    w = jax.random.normal(k1, (fan_in, cout), jnp.float32) / np.sqrt(fan_in)
    w = jnp.pad(w, ((0, kp - fan_in), (0, npad - cout))).astype(jnp.bfloat16)
    if bias:
        b = jax.random.normal(k2, (1, cout), jnp.float32) * 0.01
        b = jnp.pad(b, ((0, 0), (0, npad - cout)))
    else:
        b = jnp.zeros((1, npad), jnp.float32)
    return {'w': w, 'b': b, 'cout': cout, 'kp': kp}


def make_params(key, num_classes):
    keys = iter(jax.random.split(key, 256))
    p = {}
    p['conv1'] = _pack_conv(next(keys), 7, 7, 5, 64)

    def make_resnet_layer(inplanes, planes, n_blocks):
        blocks = []
        for b in range(n_blocks):
            cin = inplanes if b == 0 else planes * 4
            blk = {
                'w1': _pack_conv(next(keys), 1, 1, cin, planes),
                'w2': _pack_conv(next(keys), 3, 3, planes, planes),
                'w3': _pack_conv(next(keys), 1, 1, planes, planes * 4),
            }
            if b == 0:
                blk['wd'] = _pack_conv(next(keys), 1, 1, inplanes, planes * 4)
            blocks.append(blk)
        return blocks

    p['layer1'] = make_resnet_layer(64, 64, 3)       # -> 256 ch
    p['layer2'] = make_resnet_layer(256, 128, 4)     # -> 512 ch, /2
    p['layer3'] = make_resnet_layer(512, 256, 6)     # -> 1024 ch, /2

    p['bridge'] = _pack_conv(next(keys), 3, 3, 1024, 4096)
    p['dec1'] = _pack_conv(next(keys), 3, 3, 1024 + 512, 512 * 4)
    p['dec2'] = _pack_conv(next(keys), 3, 3, 512 + 256, 256 * 4)
    p['dec3'] = _pack_conv(next(keys), 3, 3, 256 + 64, 64 * 4)
    p['final1'] = _pack_conv(next(keys), 3, 3, 64, 32, bias=True)
    p['final2'] = _pack_conv(next(keys), 1, 1, 32, num_classes, bias=True)
    return p


# ------------------------------------------------------------------ #
# ResUNet forward
# ------------------------------------------------------------------ #

def resunet_forward(x_nchw, p):
    x = jnp.transpose(x_nchw, (0, 2, 3, 1)).astype(jnp.bfloat16)   # NCHW -> NHWC

    y1, m1 = conv_bn(x, p['conv1'], 7, 7, 2, 3, relu=True)
    x1 = to_nhwc(y1, m1)                       # (n, H/2, W/2, 64), bf16
    x_pool = maxpool_3x3_s2_p1(x1)

    e1 = run_layer(x_pool, p['layer1'], 1)
    e2 = run_layer(e1, p['layer2'], 2)
    e3 = run_layer(e2, p['layer3'], 2)

    bridge = decoder_block(e3, p['bridge'])
    d2 = decoder_block(jnp.concatenate([bridge, e2], axis=-1), p['dec1'])
    d3 = decoder_block(jnp.concatenate([d2, e1], axis=-1), p['dec2'])
    d4 = decoder_block(jnp.concatenate([d3, x1], axis=-1), p['dec3'])

    yf, mf = conv_bn(d4, p['final1'], 3, 3, 1, 1, relu=True)
    f = to_nhwc(yf, mf)
    y2, meta2, _ = conv2d(f, p['final2'], 1, 1, 1, 0)
    y2 = sigmoid2d(y2)
    n, oh, ow, cout, m = meta2
    out = y2[:m, :cout].reshape(n, oh, ow, cout)
    return jnp.transpose(out, (0, 3, 1, 2))          # back to NCHW


# ------------------------------------------------------------------ #

if __name__ == "__main__":
    num_classes = 3
    key = jax.random.PRNGKey(0)
    k_x, k_p = jax.random.split(key)

    x = jax.random.normal(k_x, (2, 5, 16, 16), jnp.float32)   # NCHW, 5 input ch
    params = make_params(k_p, num_classes)

    out = resunet_forward(x, params)
    out = jax.block_until_ready(out)

    assert out.shape == (2, num_classes, 16, 16), out.shape
    assert bool(jnp.all(jnp.isfinite(out)))
    assert bool(jnp.all(out >= 0.0)) and bool(jnp.all(out <= 1.0))  # sigmoid range
    print("KERNEL_OK")
</pallas_src>

<mosaic_0001>
module attributes {stable_mosaic.version = 11 : i64} {
  func.func @_conv_mm_kernel(%arg0: i32, %arg1: i32, %arg2: i32, %arg3: memref<128x256xbf16, #tpu.memory_space<vmem>>, %arg4: memref<256x128xbf16, #tpu.memory_space<vmem>>, %arg5: memref<1x128xf32, #tpu.memory_space<vmem>>, %arg6: memref<128x128xbf16, #tpu.memory_space<vmem>>, %arg7: memref<8x128xf32, #tpu.memory_space<vmem>>, %arg8: memref<8x128xf32, #tpu.memory_space<vmem>>, %arg9: memref<128x128xf32, #tpu.memory_space<vmem>>) attributes {dimension_semantics = [#tpu.dimension_semantics<parallel>, #tpu.dimension_semantics<parallel>, #tpu.dimension_semantics<arbitrary>], iteration_bounds = array<i64: 1, 1, 1>, scalar_prefetch = 0 : i64, scratch_operands = 1 : i64, tpu.core_type = #tpu.core_type<tc>, window_params = [{transform_indices = @transform_0, window_bounds = array<i64: 128, 256>}, {transform_indices = @transform_1, window_bounds = array<i64: 256, 128>}, {transform_indices = @transform_2, window_bounds = array<i64: 1, 128>}, {transform_indices = @transform_3, window_bounds = array<i64: 128, 128>}, {transform_indices = @transform_4, window_bounds = array<i64: 8, 128>}, {transform_indices = @transform_5, window_bounds = array<i64: 8, 128>}]} {
    %c128_i32 = arith.constant 128 : i32
    %0 = arith.muli %arg0, %c128_i32 : i32
    %1 = tpu.iota {dimensions = array<i32: 0>} : vector<128x1xi32>
    %2 = vector.broadcast %0 : i32 to vector<128x1xi32>
    %3 = arith.addi %2, %1 : vector<128x1xi32>
    %c128_i32_0 = arith.constant 128 : i32
    %4 = vector.broadcast %c128_i32_0 : i32 to vector<128x1xi32>
    %5 = arith.cmpi slt, %3, %4 : vector<128x1xi32>
    %c0_i32 = arith.constant 0 : i32
    %6 = arith.cmpi eq, %arg2, %c0_i32 : i32
    %7 = arith.extui %6 : i1 to i32
    %c0_i32_1 = arith.constant 0 : i32
    %8 = arith.cmpi ne, %7, %c0_i32_1 : i32
    scf.if %8 {
      %cst_11 = arith.constant 0.000000e+00 : f32
      %18 = vector.broadcast %cst_11 : f32 to vector<128x128xf32>
      %c0_12 = arith.constant 0 : index
      %c0_13 = arith.constant 0 : index
      %19 = vector.load %arg9[%c0_12, %c0_13] : memref<128x128xf32, #tpu.memory_space<vmem>>, vector<128x128xf32>
      tpu.vector_store %arg9[%c0_12, %c0_13], %18 {strides = array<i32>} : memref<128x128xf32, #tpu.memory_space<vmem>>, vector<128x128xf32>,
    } else {
    }
    %c0 = arith.constant 0 : index
    %c0_2 = arith.constant 0 : index
    %9 = vector.load %arg9[%c0, %c0_2] : memref<128x128xf32, #tpu.memory_space<vmem>>, vector<128x128xf32>
    %c0_3 = arith.constant 0 : index
    %c0_4 = arith.constant 0 : index
    %10 = vector.load %arg3[%c0_3, %c0_4] : memref<128x256xbf16, #tpu.memory_space<vmem>>, vector<128x256xbf16>
    %c0_5 = arith.constant 0 : index
    %c0_6 = arith.constant 0 : index
    %11 = vector.load %arg4[%c0_5, %c0_6] : memref<256x128xbf16, #tpu.memory_space<vmem>>, vector<256x128xbf16>
    %cst = arith.constant dense<0.000000e+00> : vector<128x128xf32>
    %12 = tpu.matmul %10, %11, %cst {dimension_numbers = #tpu.dot_dimension_numbers<[1], [0], [0], [1], [0, 0, 1, 1], [], []>} : vector<128x256xbf16>, vector<256x128xbf16>, vector<128x128xf32> -> vector<128x128xf32>
    %13 = arith.addf %9, %12 : vector<128x128xf32>
    %c0_7 = arith.constant 0 : index
    %c0_8 = arith.constant 0 : index
    %14 = vector.load %arg9[%c0_7, %c0_8] : memref<128x128xf32, #tpu.memory_space<vmem>>, vector<128x128xf32>
    tpu.vector_store %arg9[%c0_7, %c0_8], %13 {strides = array<i32>} : memref<128x128xf32, #tpu.memory_space<vmem>>, vector<128x128xf32>,
    %c0_i32_9 = arith.constant 0 : i32
    %15 = arith.cmpi eq, %arg2, %c0_i32_9 : i32
    %16 = arith.extui %15 : i1 to i32
    %c0_i32_10 = arith.constant 0 : i32
    %17 = arith.cmpi ne, %16, %c0_i32_10 : i32
    scf.if %17 {
      %c0_11 = arith.constant 0 : index
      %c0_12 = arith.constant 0 : index
      %18 = vector.load %arg9[%c0_11, %c0_12] : memref<128x128xf32, #tpu.memory_space<vmem>>, vector<128x128xf32>
      %c0_13 = arith.constant 0 : index
      %c0_14 = arith.constant 0 : index
      %19 = vector.load %arg5[%c0_13, %c0_14] : memref<1x128xf32, #tpu.memory_space<vmem>>, vector<1x128xf32>
      %cst_15 = arith.constant 0.000000e+00 : f32
      %20 = vector.shape_cast %5 : vector<128x1xi1> to vector<128x1xi1>
      %21 = vector.broadcast %20 : vector<128x1xi1> to vector<128x128xi1>
      %22 = vector.shape_cast %19 : vector<1x128xf32> to vector<1x128xf32>
      %23 = vector.broadcast %22 : vector<1x128xf32> to vector<128x128xf32>
      %24 = vector.broadcast %cst_15 : f32 to vector<128x128xf32>
      %25 = arith.select %21, %23, %24 : vector<128x128xi1>, vector<128x128xf32>
      %26 = arith.addf %18, %25 : vector<128x128xf32>
      %27 = arith.truncf %26 : vector<128x128xf32> to vector<128x128xbf16>
      %c0_16 = arith.constant 0 : index
      %c0_17 = arith.constant 0 : index
      %28 = vector.load %arg6[%c0_16, %c0_17] : memref<128x128xbf16, #tpu.memory_space<vmem>>, vector<128x128xbf16>
      tpu.vector_store %arg6[%c0_16, %c0_17], %27 {strides = array<i32>} : memref<128x128xbf16, #tpu.memory_space<vmem>>, vector<128x128xbf16>,
      %cst_18 = arith.constant dense<0.000000e+00> : vector<128xf32>
      %29 = vector.multi_reduction <add>, %26, %cst_18 [0] : vector<128x128xf32> to vector<128xf32>
      %30 = vector.shape_cast %29 : vector<128xf32> to vector<1x128xf32>
      %31 = arith.mulf %26, %26 : vector<128x128xf32>
      %cst_19 = arith.constant dense<0.000000e+00> : vector<128xf32>
      %32 = vector.multi_reduction <add>, %31, %cst_19 [0] : vector<128x128xf32> to vector<128xf32>
      %33 = vector.shape_cast %32 : vector<128xf32> to vector<1x128xf32>
      %34 = vector.shape_cast %30 : vector<1x128xf32> to vector<1x128xf32>
      %35 = vector.broadcast %34 : vector<1x128xf32> to vector<8x128xf32>
      %c0_20 = arith.constant 0 : index
      %c0_21 = arith.constant 0 : index
      %36 = vector.load %arg7[%c0_20, %c0_21] : memref<8x128xf32, #tpu.memory_space<vmem>>, vector<8x128xf32>
      tpu.vector_store %arg7[%c0_20, %c0_21], %35 {strides = array<i32>} : memref<8x128xf32, #tpu.memory_space<vmem>>, vector<8x128xf32>,
      %37 = vector.shape_cast %33 : vector<1x128xf32> to vector<1x128xf32>
      %38 = vector.broadcast %37 : vector<1x128xf32> to vector<8x128xf32>
      %c0_22 = arith.constant 0 : index
      %c0_23 = arith.constant 0 : index
      %39 = vector.load %arg8[%c0_22, %c0_23] : memref<8x128xf32, #tpu.memory_space<vmem>>, vector<8x128xf32>
      tpu.vector_store %arg8[%c0_22, %c0_23], %38 {strides = array<i32>} : memref<8x128xf32, #tpu.memory_space<vmem>>, vector<8x128xf32>,
    } else {
    }
    return
  }
  func.func @transform_0(%arg0: i32, %arg1: i32, %arg2: i32) -> (i32, i32) {
    %c0_i32 = arith.constant 0 : i32
    return %arg0, %arg2 : i32, i32
  }
  func.func @transform_1(%arg0: i32, %arg1: i32, %arg2: i32) -> (i32, i32) {
    %c0_i32 = arith.constant 0 : i32
    return %arg2, %arg1 : i32, i32
  }
  func.func @transform_2(%arg0: i32, %arg1: i32, %arg2: i32) -> (i32, i32) {
    %c0_i32 = arith.constant 0 : i32
    %c0_i32_0 = arith.constant 0 : i32
    return %c0_i32, %arg1 : i32, i32
  }
  func.func @transform_3(%arg0: i32, %arg1: i32, %arg2: i32) -> (i32, i32) {
    %c0_i32 = arith.constant 0 : i32
    return %arg0, %arg1 : i32, i32
  }
  func.func @transform_4(%arg0: i32, %arg1: i32, %arg2: i32) -> (i32, i32) {
    %c0_i32 = arith.constant 0 : i32
    return %arg0, %arg1 : i32, i32
  }
  func.func @transform_5(%arg0: i32, %arg1: i32, %arg2: i32) -> (i32, i32) {
    %c0_i32 = arith.constant 0 : i32
    return %arg0, %arg1 : i32, i32
  }
}

</mosaic_0001>

<bundles_post_ra>
// kernel: tpu_custom_call.1
= control target key start
LH: loop header
LB: loop body
LE: loop exit
PB: predicated region body
PF: predicated region fallthrough
CT: control target
= control target key end

     0   :  { %11 = vsyncpa [#allocation4], 0  ;;  %s1284_s0 = inlined_call_operand.hbm [shape: bf16[128,256], index: 0, kind: input, shape index: {}]   ;;  %s1285_s1 = inlined_call_operand.hbm [shape: bf16[256,128], index: 1, kind: input, shape index: {}]   ;;  %s1286_s2 = inlined_call_operand.vmem [shape: f32[1,128], index: 2, kind: input, shape index: {}]   ;;  %s1287_s3 = inlined_call_operand.hbm [shape: bf16[128,128], index: 3, kind: output, shape index: {0}]   ;;  %s1288_s4 = inlined_call_operand.hbm [shape: f32[8,128], index: 4, kind: output, shape index: {1}]   ;;  %s1289_s5 = inlined_call_operand.hbm [shape: f32[8,128], index: 5, kind: output, shape index: {2}]  }
   0x1   :  { %12 = vsyncpa [#allocation7], 0 }
   0x2   :  { %13 = vsyncpa [#allocation5], 0 }
   0x3   :  { %14 = vsyncpa [#allocation10], 0  ;;  %s1122_s18 = smov [#allocation3]   ;;  %s1004_s22 = scalar_lea.hbm %s1284_s0, 2048 }
   0x4   :  { %s20_s19 = sshll.u32 %s1122_s18, 4  ;;  %p1005_p0 = scmp.ne.s32.totalorder %s1284_s0, %s1004_s22  ;;  %s21_s19 = int_to_ptr.vmem [resolvable:$true] %s20_s19 }
   0x5   :  { %p1008_p1 = scmp.lt.u32.totalorder %s1004_s22, %s1284_s0 }
   0x7   :  { %p1010_p2 = pnand %p1008_p1, %p1005_p0 }
   0x9   :  { %1013 = shalt.err (!%p1010_p2)
}
   0xa   :  { %s1014_s27 = scalar_lea.vmem %s21_s19, 2048  ;;  %p1019_p4 = scmp.lt.s32.totalorder %s21_s19, %s21_s19 }
   0xb   :  { %p1015_p3 = scmp.ne.s32.totalorder %s21_s19, %s1014_s27  ;;  %p1020_p5 = scmp.lt.s32.totalorder %s1014_s27, %s1014_s27 }
   0xd   :  { %p1021_p6 = por %p1020_p5, %p1019_p4 }
   0xf   :  { %p1022_p7 = pnand %p1021_p6, %p1015_p3 }
  0x11   :  { %1025 = shalt.err (!%p1022_p7)
}
  0x12   :  { %s1123_s28 = smov 128   ;;  %s1124_s29 = smov 8  }
  0x13   :  { %26 = dma.hbm_to_vmem [thread:$0]  %s1284_s0, 2048, %s21_s19, [#allocation4], %s1123_s28, %s1123_s28, %s1124_s29  }
  0x14   :  { %s1125_s7 = smov [#allocation6]   ;;  %s1026_s11 = scalar_lea.hbm %s1285_s1, 2048 }
  0x15   :  { %s32_s8 = sshll.u32 %s1125_s7, 4  ;;  %p1027_p8 = scmp.ne.s32.totalorder %s1285_s1, %s1026_s11  ;;  %s33_s8 = int_to_ptr.vmem [resolvable:$true] %s32_s8 }
  0x16   :  { %p1030_p9 = scmp.lt.u32.totalorder %s1026_s11, %s1285_s1 }
  0x18   :  { %p1032_p10 = pnand %p1030_p9, %p1027_p8 }
  0x1a   :  { %1035 = shalt.err (!%p1032_p10)
}
  0x1b   :  { %s1036_s16 = scalar_lea.vmem %s33_s8, 2048  ;;  %p1041_p12 = scmp.lt.s32.totalorder %s33_s8, %s33_s8 }
  0x1c   :  { %p1037_p11 = scmp.ne.s32.totalorder %s33_s8, %s1036_s16  ;;  %p1042_p13 = scmp.lt.s32.totalorder %s1036_s16, %s1036_s16 }
  0x1e   :  { %p1043_p0 = por %p1042_p13, %p1041_p12 }
  0x20   :  { %p1044_p1 = pnand %p1043_p0, %p1037_p11 }
  0x22   :  { %1047 = shalt.err (!%p1044_p1)
}
  0x23   :  { %s1126_s0 = smov 64   ;;  %s1127_s17 = smov 4  }
  0x24   :  { %38 = dma.hbm_to_vmem [thread:$0]  %s1285_s1, 2048, %s33_s8, [#allocation7], %s1126_s0, %s1126_s0, %s1127_s17  }
  0x25   :  { %1114 = dma.done.wait [#allocation4], 2048  }
  0x26   :  { %1115 = vsyncadd [#allocation4], 4294965248 }
  0x27   :  { %1116 = dma.done.wait [#allocation7], 2048  }
  0x28   :  { %1117 = vsyncadd [#allocation7], 4294965248  ;;  %v964_v0 = vld [vmem:[#allocation6 + $0x40] sm:$0xff]   ;;  %v966_v2 = vld [vmem:[#allocation6 + $0x48] sm:$0xff]  }
  0x29   :  { %v965_v1 = vld [vmem:[#allocation6] sm:$0xff]   ;;  %875 = vmatprep.subr.bf16.mxu0 %v964_v0  ;;  %939 = vmatprep.subr.bf16.mxu1 %v964_v0  ;;  %v967_v3 = vld [vmem:[#allocation6 + $0x8] sm:$0xff]   ;;  %v968_v4 = vld [vmem:[#allocation6 + $0x50] sm:$0xff]  }
  0x2a   :  { %876 = vmatpush3.bf16.msra.mxu0 %v965_v1  ;;  %947 = vmatpush3.bf16.msra.mxu1 %v965_v1  ;;  %v969_v5 = vld [vmem:[#allocation6 + $0x10] sm:$0xff]   ;;  %v970_v6 = vld [vmem:[#allocation6 + $0x58] sm:$0xff]   ;;  %v972_v8 = vld [vmem:[#allocation6 + $0x60] sm:$0xff]  }
  0x2b   :  { %877 = vmatprep.subr.bf16.mxu0 %v966_v2  ;;  %940 = vmatprep.subr.bf16.mxu1 %v966_v2  ;;  %v971_v7 = vld [vmem:[#allocation6 + $0x18] sm:$0xff]   ;;  %v973_v9 = vld [vmem:[#allocation6 + $0x20] sm:$0xff]   ;;  %v974_v10 = vld [vmem:[#allocation6 + $0x68] sm:$0xff]  }
  0x2c   :  { %v982_v11 = vld [vmem:[#allocation3 + $0x4] ss:$8 sps:$4 sm:$0xff]   ;;  %v976_v14 = vld [vmem:[#allocation6 + $0x70] sm:$0xff]   ;;  %v978_v16 = vld [vmem:[#allocation6 + $0x78] sm:$0xff]  }
  0x2d   :  { %v975_v12 = vld [vmem:[#allocation6 + $0x28] sm:$0xff]   ;;  %391 = vmatprep.mubr.bf16.mxu0 %v982_v11  ;;  %v977_v15 = vld [vmem:[#allocation6 + $0x30] sm:$0xff]   ;;  %v979_v17 = vld [vmem:[#allocation6 + $0x38] sm:$0xff]  }
  0x2e   :  { %878 = vmatpush3.bf16.msra.mxu0 %v967_v3  ;;  %948 = vmatpush3.bf16.msra.mxu1 %v967_v3  ;;  %v988_v13 = vld [vmem:[#allocation3 + $0x44] ss:$8 sps:$4 sm:$0xff]   ;;  %v980_v18 = vld [vmem:[#allocation3] ss:$8 sps:$4 sm:$0xff]   ;;  %v983_v20 = vld [vmem:[#allocation3 + $0x14] ss:$8 sps:$4 sm:$0xff]  }
  0x2f   :  { %879 = vmatprep.subr.bf16.mxu0 %v968_v4  ;;  %941 = vmatprep.subr.bf16.mxu1 %v968_v4  ;;  %v986_v19 = vld [vmem:[#allocation3 + $0x40] ss:$8 sps:$4 sm:$0xff]   ;;  %v992_v21 = vld [vmem:[#allocation3 + $0x54] ss:$8 sps:$4 sm:$0xff]   ;;  %v985_v22 = vld [vmem:[#allocation3 + $0x10] ss:$8 sps:$4 sm:$0xff]  }
  0x30   :  { %423 = vmatprep.mubr.bf16.mxu1 %v988_v13  ;;  %v994_v23 = vld [vmem:[#allocation3 + $0x50] ss:$8 sps:$4 sm:$0xff]   ;;  %v989_v24 = vld [vmem:[#allocation3 + $0x24] ss:$8 sps:$4 sm:$0xff]   ;;  %v991_v26 = vld [vmem:[#allocation3 + $0x20] ss:$8 sps:$4 sm:$0xff]  }
  0x31   :  { %v998_v25 = vld [vmem:[#allocation3 + $0x64] ss:$8 sps:$4 sm:$0xff]   ;;  %v1000_v27 = vld [vmem:[#allocation3 + $0x60] ss:$8 sps:$4 sm:$0xff]   ;;  %v995_v28 = vld [vmem:[#allocation3 + $0x34] ss:$8 sps:$4 sm:$0xff]  }
  0x32   :  { %880 = vmatpush3.bf16.msra.mxu0 %v969_v5  ;;  %949 = vmatpush3.bf16.msra.mxu1 %v969_v5  ;;  %v1001_v29 = vld [vmem:[#allocation3 + $0x74] ss:$8 sps:$4 sm:$0xff]   ;;  %v997_v30 = vld [vmem:[#allocation3 + $0x30] ss:$8 sps:$4 sm:$0xff]   ;;  %v1191_v35 = vld [vmem:[%s1286_s2] ss:$0 sm:$0xff] }
  0x33   :  { %881 = vmatprep.subr.bf16.mxu0 %v970_v6  ;;  %942 = vmatprep.subr.bf16.mxu1 %v970_v6  ;;  %v1003_v31 = vld [vmem:[#allocation3 + $0x70] ss:$8 sps:$4 sm:$0xff]   ;;  %s1128_s2 = smov [#allocation8]  }
  0x34   :  { %s723_s21 = sshll.u32 %s1128_s2, 4  ;;  %s724_s21 = int_to_ptr.vmem [resolvable:$true] %s723_s21 }
  0x35   :  { %s1048_s22 = scalar_lea.vmem %s724_s21, 1024  ;;  %p1053_p3 = scmp.lt.s32.totalorder %s724_s21, %s724_s21 }
  0x36   :  { %882 = vmatpush3.bf16.msra.mxu0 %v971_v7  ;;  %950 = vmatpush3.bf16.msra.mxu1 %v971_v7  ;;  %p1049_p2 = scmp.ne.s32.totalorder %s724_s21, %s1048_s22  ;;  %p1054_p4 = scmp.lt.s32.totalorder %s1048_s22, %s1048_s22 }
  0x37   :  { %883 = vmatprep.subr.bf16.mxu0 %v972_v8  ;;  %943 = vmatprep.subr.bf16.mxu1 %v972_v8 }
  0x38   :  { %p1055_p5 = por %p1054_p4, %p1053_p3 }
  0x3a   :  { %884 = vmatpush3.bf16.msra.mxu0 %v973_v9  ;;  %951 = vmatpush3.bf16.msra.mxu1 %v973_v9  ;;  %p1056_p6 = pnand %p1055_p5, %p1049_p2 }
  0x3b   :  { %885 = vmatprep.subr.bf16.mxu0 %v974_v10  ;;  %944 = vmatprep.subr.bf16.mxu1 %v974_v10 }
  0x3e   :  { %886 = vmatpush3.bf16.msra.mxu0 %v975_v12  ;;  %952 = vmatpush3.bf16.msra.mxu1 %v975_v12 }
  0x3f   :  { %887 = vmatprep.subr.bf16.mxu0 %v976_v14  ;;  %945 = vmatprep.subr.bf16.mxu1 %v976_v14 }
  0x42   :  { %888 = vmatpush3.bf16.msra.mxu0 %v977_v15  ;;  %953 = vmatpush3.bf16.msra.mxu1 %v977_v15 }
  0x43   :  { %889 = vmatprep.subr.bf16.mxu0 %v978_v16  ;;  %946 = vmatprep.subr.bf16.mxu1 %v978_v16 }
  0x46   :  { %890 = vmatpush3.bf16.msra.mxu0 %v979_v17  ;;  %954 = vmatpush3.bf16.msra.mxu1 %v979_v17 }
  0x49   :  { %392 = vmatmul.mubr.bf16.vlgmr.msra.gmra.mrb[0].mxu0 %v980_v18  ;;  %424 = vmatmul.mubr.bf16.vlgmr.msra.gmra.mrb[0].mxu1 %v986_v19 }
  0x4a   :  { %399 = vmatprep.mubr.bf16.mxu0 %v983_v20  ;;  %431 = vmatprep.mubr.bf16.mxu1 %v992_v21 }
  0x51   :  { %400 = vmatmul.mubr.bf16.gmra.mrb[4].mxu0 %v985_v22  ;;  %432 = vmatmul.mubr.bf16.gmra.mrb[4].mxu1 %v994_v23 }
  0x52   :  { %407 = vmatprep.mubr.bf16.mxu0 %v989_v24  ;;  %439 = vmatprep.mubr.bf16.mxu1 %v998_v25 }
  0x59   :  { %408 = vmatmul.mubr.bf16.gmra.mrb[8].mxu0 %v991_v26  ;;  %440 = vmatmul.mubr.bf16.gmra.mrb[8].mxu1 %v1000_v27 }
  0x5a   :  { %415 = vmatprep.mubr.bf16.mxu0 %v995_v28  ;;  %447 = vmatprep.mubr.bf16.mxu1 %v1001_v29 }
  0x61   :  { %416 = vmatmul.mubr.bf16.gmra.mrb[12].mxu0 %v997_v30  ;;  %448 = vmatmul.mubr.bf16.gmra.mrb[12].mxu1 %v1003_v31 }
 0x11c   :  { %v891_v32 = vpop.f32.mrb[0].mxu0  ;;  %v915_v33 = vpop.f32.mrb[0].mxu1 }
 0x11d   :  { %v892_v34 = vpop.f32.mrb[1].mxu0  ;;  %v916_v36 = vpop.f32.mrb[1].mxu1 }
 0x11e   :  { %v893_v37 = vadd.f32 %v892_v34, %v891_v32  ;;  %v894_v38 = vpop.f32.mrb[2].mxu0  ;;  %v917_v39 = vadd.f32 %v916_v36, %v915_v33  ;;  %v918_v40 = vpop.f32.mrb[2].mxu1 }
 0x11f   :  { %v895_v41 = vpop.f32.mrb[3].mxu0  ;;  %v919_v42 = vpop.f32.mrb[3].mxu1 }
 0x120   :  { %v562_v43 = vadd.f32 %v893_v37, %v1191_v35  ;;  %v896_v44 = vadd.f32 %v895_v41, %v894_v38  ;;  %v1195_v45 = vadd.f32 %v917_v39, %v1191_v35  ;;  %v920_v46 = vadd.f32 %v919_v42, %v918_v40 }
 0x122   :  { %v563_v47 = vadd.f32 %v896_v44, %v1191_v35  ;;  %v1199_v48 = vadd.f32 %v920_v46, %v1191_v35  ;;  %v679_v49 = vmul.f32 %v562_v43, %v562_v43 }
 0x124   :  { %v831_v50 = vpack.c.bf16 %v563_v47, %v562_v43  ;;  %v658_v51 = vadd.f32 %v563_v47, %v562_v43  ;;  %v680_v52 = vmul.f32 %v563_v47, %v563_v47  ;;  %v897_v53 = vpop.f32.mrb[4].mxu0  ;;  %v851_v54 = vpack.c.bf16 %v1199_v48, %v1195_v45  ;;  %v921_v55 = vpop.f32.mrb[4].mxu1 }
 0x125   :  { %v898_v56 = vpop.f32.mrb[5].mxu0  ;;  %v922_v57 = vpop.f32.mrb[5].mxu1 }
 0x126   :  { %832 = vst [vmem:[#allocation8] sm:$0xff] %v831_v50   ;;  %v695_v58 = vadd.f32 %v680_v52, %v679_v49  ;;  %v899_v59 = vadd.f32 %v898_v56, %v897_v53  ;;  %v900_v60 = vpop.f32.mrb[6].mxu0  ;;  %871 = vst [vmem:[#allocation8 + $0x20] sm:$0xff] %v851_v54   ;;  %v923_v61 = vadd.f32 %v922_v57, %v921_v55  ;;  %v924_v62 = vpop.f32.mrb[6].mxu1 }
 0x127   :  { %v901_v63 = vpop.f32.mrb[7].mxu0  ;;  %v925_v0 = vpop.f32.mrb[7].mxu1 }
 0x128   :  { %v564_v1 = vadd.f32 %v899_v59, %v1191_v35  ;;  %v902_v2 = vadd.f32 %v901_v63, %v900_v60  ;;  %v926_v3 = vadd.f32 %v925_v0, %v924_v62  ;;  %v1205_v4 = vadd.f32 %v923_v61, %v1191_v35 }
 0x12a   :  { %v659_v5 = vadd.f32 %v658_v51, %v564_v1  ;;  %v681_v6 = vmul.f32 %v564_v1, %v564_v1  ;;  %v565_v7 = vadd.f32 %v902_v2, %v1191_v35  ;;  %v1209_v8 = vadd.f32 %v926_v3, %v1191_v35 }
 0x12c   :  { %v696_v9 = vadd.f32 %v695_v58, %v681_v6  ;;  %v836_v10 = vpack.c.bf16 %v565_v7, %v564_v1  ;;  %v660_v11 = vadd.f32 %v659_v5, %v565_v7  ;;  %v682_v12 = vmul.f32 %v565_v7, %v565_v7  ;;  %v903_v13 = vpop.f32.mrb[8].mxu0  ;;  %v927_v14 = vpop.f32.mrb[8].mxu1 }
 0x12d   :  { %v904_v15 = vpop.f32.mrb[9].mxu0  ;;  %v856_v16 = vpack.c.bf16 %v1209_v8, %v1205_v4  ;;  %v928_v17 = vpop.f32.mrb[9].mxu1  ;;  %v687_v1 = vmul.f32 %v1195_v45, %v1195_v45  ;;  %v688_v5 = vmul.f32 %v1199_v48, %v1199_v48 }
 0x12e   :  { %868 = vst [vmem:[#allocation8 + $0x8] sm:$0xff] %v836_v10   ;;  %v697_v18 = vadd.f32 %v696_v9, %v682_v12  ;;  %v905_v19 = vadd.f32 %v904_v15, %v903_v13  ;;  %v906_v20 = vpop.f32.mrb[10].mxu0  ;;  %v929_v21 = vadd.f32 %v928_v17, %v927_v14  ;;  %v930_v22 = vpop.f32.mrb[10].mxu1 }
 0x12f   :  { %v907_v23 = vpop.f32.mrb[11].mxu0  ;;  %872 = vst [vmem:[#allocation8 + $0x28] sm:$0xff] %v856_v16   ;;  %v931_v24 = vpop.f32.mrb[11].mxu1 }
 0x130   :  { %v566_v25 = vadd.f32 %v905_v19, %v1191_v35  ;;  %v908_v26 = vadd.f32 %v907_v23, %v906_v20  ;;  %v932_v27 = vadd.f32 %v931_v24, %v930_v22  ;;  %v1215_v28 = vadd.f32 %v929_v21, %v1191_v35 }
 0x132   :  { %v661_v29 = vadd.f32 %v660_v11, %v566_v25  ;;  %v683_v30 = vmul.f32 %v566_v25, %v566_v25  ;;  %v567_v31 = vadd.f32 %v908_v26, %v1191_v35  ;;  %v1219_v32 = vadd.f32 %v932_v27, %v1191_v35 }
 0x134   :  { %v698_v33 = vadd.f32 %v697_v18, %v683_v30  ;;  %v841_v34 = vpack.c.bf16 %v567_v31, %v566_v25  ;;  %v662_v36 = vadd.f32 %v661_v29, %v567_v31  ;;  %v684_v37 = vmul.f32 %v567_v31, %v567_v31  ;;  %v909_v38 = vpop.f32.mrb[12].mxu0  ;;  %v933_v39 = vpop.f32.mrb[12].mxu1 }
 0x135   :  { %v910_v40 = vpop.f32.mrb[13].mxu0  ;;  %v861_v41 = vpack.c.bf16 %v1219_v32, %v1215_v28  ;;  %v934_v42 = vpop.f32.mrb[13].mxu1 }
 0x136   :  { %869 = vst [vmem:[#allocation8 + $0x10] sm:$0xff] %v841_v34   ;;  %v699_v43 = vadd.f32 %v698_v33, %v684_v37  ;;  %v911_v44 = vadd.f32 %v910_v40, %v909_v38  ;;  %v912_v46 = vpop.f32.mrb[14].mxu0  ;;  %v935_v47 = vadd.f32 %v934_v42, %v933_v39  ;;  %v936_v49 = vpop.f32.mrb[14].mxu1 }
 0x137   :  { %v913_v50 = vpop.f32.mrb[15].mxu0  ;;  %873 = vst [vmem:[#allocation8 + $0x30] sm:$0xff] %v861_v41   ;;  %v937_v51 = vpop.f32.mrb[15].mxu1 }
 0x138   :  { %v568_v52 = vadd.f32 %v911_v44, %v1191_v35  ;;  %v914_v53 = vadd.f32 %v913_v50, %v912_v46  ;;  %v938_v54 = vadd.f32 %v937_v51, %v936_v49  ;;  %v576_v55 = vadd.f32 %v935_v47, %v1191_v35 }
 0x13a   :  { %v663_v56 = vadd.f32 %v662_v36, %v568_v52  ;;  %v685_v57 = vmul.f32 %v568_v52, %v568_v52  ;;  %v569_v58 = vadd.f32 %v914_v53, %v1191_v35  ;;  %v577_v59 = vadd.f32 %v938_v54, %v1191_v35 }
 0x13c   :  { %v700_v60 = vadd.f32 %v699_v43, %v685_v57  ;;  %v846_v61 = vpack.c.bf16 %v569_v58, %v568_v52  ;;  %v664_v62 = vadd.f32 %v663_v56, %v569_v58  ;;  %v686_v63 = vmul.f32 %v569_v58, %v569_v58 }
 0x13d   :  { %v866_v0 = vpack.c.bf16 %v577_v59, %v576_v55 }
 0x13e   :  { %870 = vst [vmem:[#allocation8 + $0x18] sm:$0xff] %v846_v61   ;;  %v665_v2 = vadd.f32 %v664_v62, %v1195_v45  ;;  %v701_v3 = vadd.f32 %v700_v60, %v686_v63 }
 0x13f   :  { %874 = vst [vmem:[#allocation8 + $0x38] sm:$0xff] %v866_v0  }
 0x140   :  { %v666_v6 = vadd.f32 %v665_v2, %v1199_v48  ;;  %v702_v35 = vadd.f32 %v701_v3, %v687_v1 }
 0x141   :  { %1059 = shalt.err (!%p1056_p6)
}
 0x142   :  { %s1060_s25 = scalar_lea.hbm %s1287_s3, 1024 }
 0x143   :  { %p1061_p7 = scmp.ne.s32.totalorder %s1287_s3, %s1060_s25  ;;  %p1064_p8 = scmp.lt.u32.totalorder %s1060_s25, %s1287_s3 }
 0x145   :  { %p1066_p9 = pnand %p1064_p8, %p1061_p7 }
 0x147   :  { %1069 = shalt.err (!%p1066_p9)
}
 0x148   :  { %729 = dma.vmem_to_hbm [thread:$0]  %s724_s21, 1024, %s1287_s3, [#allocation5], %s1126_s0, %s1126_s0, %s1127_s17   ;;  %v689_v45 = vmul.f32 %v1205_v4, %v1205_v4  ;;  %v703_v48 = vadd.f32 %v702_v35, %v688_v5  ;;  %v667_v7 = vadd.f32 %v666_v6, %v1205_v4  ;;  %v690_v9 = vmul.f32 %v1209_v8, %v1209_v8 }
 0x149   :  { %v691_v13 = vmul.f32 %v1215_v28, %v1215_v28  ;;  %v692_v17 = vmul.f32 %v1219_v32, %v1219_v32  ;;  %v693_v18 = vmul.f32 %v576_v55, %v576_v55  ;;  %v694_v22 = vmul.f32 %v577_v59, %v577_v59  ;;  %s1129_s3 = smov [#allocation9]   ;;  %s1130_s8 = smov [#allocation11]  }
 0x14a   :  { %v668_v10 = vadd.f32 %v667_v7, %v1209_v8  ;;  %v704_v11 = vadd.f32 %v703_v48, %v689_v45  ;;  %s736_s7 = sshll.u32 %s1129_s3, 4  ;;  %s746_s9 = sshll.u32 %s1130_s8, 4  ;;  %s737_s7 = int_to_ptr.vmem [resolvable:$true] %s736_s7  ;;  %s747_s9 = int_to_ptr.vmem [resolvable:$true] %s746_s9 }
 0x14b   :  { %s1070_s10 = scalar_lea.vmem %s737_s7, 128  ;;  %p1075_p11 = scmp.lt.s32.totalorder %s737_s7, %s737_s7 }
 0x14c   :  { %v669_v12 = vadd.f32 %v668_v10, %v1215_v28  ;;  %v705_v14 = vadd.f32 %v704_v11, %v690_v9  ;;  %p1071_p10 = scmp.ne.s32.totalorder %s737_s7, %s1070_s10  ;;  %p1076_p12 = scmp.lt.s32.totalorder %s1070_s10, %s1070_s10 }
 0x14e   :  { %v706_v15 = vadd.f32 %v705_v14, %v691_v13  ;;  %v670_v16 = vadd.f32 %v669_v12, %v1219_v32  ;;  %p1077_p13 = por %p1076_p12, %p1075_p11 }
 0x150   :  { %v707_v4 = vadd.f32 %v706_v15, %v692_v17  ;;  %v671_v19 = vadd.f32 %v670_v16, %v576_v55  ;;  %p1078_p0 = pnand %p1077_p13, %p1071_p10 }
 0x152   :  { %v708_v20 = vadd.f32 %v707_v4, %v693_v18  ;;  %v672_v21 = vadd.f32 %v671_v19, %v577_v59 }
 0x154   :  { %v673_v8 = vrot.slane %v672_v21, 4  ;;  %v709_v23 = vadd.f32 %v708_v20, %v694_v22 }
 0x156   :  { %v710_v24 = vrot.slane %v709_v23, 4  ;;  %v674_v25 = vadd.f32 %v673_v8, %v672_v21 }
 0x158   :  { %v675_v26 = vrot.slane %v674_v25, 2  ;;  %v711_v27 = vadd.f32 %v710_v24, %v709_v23 }
 0x15a   :  { %v676_v28 = vadd.f32 %v675_v26, %v674_v25  ;;  %v712_v29 = vrot.slane %v711_v27, 2 }
 0x15c   :  { %v677_v30 = vrot.slane %v676_v28, 1  ;;  %v713_v31 = vadd.f32 %v712_v29, %v711_v27 }
 0x15e   :  { %v678_v32 = vadd.f32 %v677_v30, %v676_v28  ;;  %v714_v33 = vrot.slane %v713_v31, 1 }
 0x160   :  { %716 = vst [vmem:[#allocation9] sm:$0xff] %v678_v32  ;;  %v715_v34 = vadd.f32 %v714_v33, %v713_v31 }
 0x161   :  { %1081 = shalt.err (!%p1078_p0)
}
 0x162   :  { %s1082_s13 = scalar_lea.hbm %s1288_s4, 128 }
 0x163   :  { %p1083_p1 = scmp.ne.s32.totalorder %s1288_s4, %s1082_s13  ;;  %p1086_p2 = scmp.lt.u32.totalorder %s1082_s13, %s1288_s4 }
 0x165   :  { %p1088_p3 = pnand %p1086_p2, %p1083_p1 }
 0x167   :  { %1091 = shalt.err (!%p1088_p3)
}
 0x168   :  { %739 = dma.vmem_to_hbm [thread:$0]  %s737_s7, 128, %s1288_s4, [#allocation10]   ;;  %717 = vst [vmem:[#allocation11] sm:$0xff] %v715_v34 }
 0x169   :  { %s1092_s19 = scalar_lea.vmem %s747_s9, 128  ;;  %p1097_p5 = scmp.lt.s32.totalorder %s747_s9, %s747_s9 }
 0x16a   :  { %p1093_p4 = scmp.ne.s32.totalorder %s747_s9, %s1092_s19  ;;  %p1098_p6 = scmp.lt.s32.totalorder %s1092_s19, %s1092_s19 }
 0x16c   :  { %p1099_p7 = por %p1098_p6, %p1097_p5 }
 0x16e   :  { %p1100_p8 = pnand %p1099_p7, %p1093_p4 }
 0x170   :  { %1103 = shalt.err (!%p1100_p8)
}
 0x171   :  { %s1104_s2 = scalar_lea.hbm %s1289_s5, 128 }
 0x172   :  { %p1105_p9 = scmp.ne.s32.totalorder %s1289_s5, %s1104_s2  ;;  %p1108_p10 = scmp.lt.u32.totalorder %s1104_s2, %s1289_s5 }
 0x174   :  { %p1110_p11 = pnand %p1108_p10, %p1105_p9 }
 0x176   :  { %1113 = shalt.err (!%p1110_p11)
}
 0x177   :  { %749 = dma.vmem_to_hbm [thread:$0]  %s747_s9, 128, %s1289_s5, [#allocation10]  }
 0x178   :  { %1118 = dma.done.wait [#allocation5], 1024  }
 0x179   :  { %1119 = vsyncadd [#allocation5], 4294966272 }
 0x17a   :  { %1120 = dma.done.wait [#allocation10], 256  }
 0x17b   :  { %1121 = vsyncadd [#allocation10], 4294967040 }
 0x17c   :  { %759 = vsyncpa [#allocation4], 1 }
 0x17d   :  { %760 = vsyncpa [#allocation7], 1 }
 0x17e   :  { %761 = vsyncpa [#allocation5], 1 }
 0x17f   :  { %762 = vsyncpa [#allocation10], 1 }

</bundles_post_ra>
